<compile_context>
chip_gen: v5e
topology: v5e:2x2
jax: 0.10.0
libtpu: 0.0.40
codegen_flags: <defaults>
</compile_context>

<pallas_src>
import jax
import jax.numpy as jnp
from jax.experimental import pallas as pl
from jax.experimental.pallas import tpu as pltpu

A_DIM = 6
S_LEN = 5
H1 = 200
H2 = 100
OUT_W = 8  # fused, lane-padded output width: [0:6]=logits, [6]=value, [7]=pad

# Batch threshold / block for the gridded (multi-core capable) path.
_BATCH_BLOCK = 128
_GRID_MIN_BATCH = 256


def _relu6(v):
    # F.relu6(x) == clamp(x, 0, 6)
    return jnp.clip(v, 0.0, 6.0)


def net_kernel(x_ref, w1_ref, b1_ref, w2_ref, b2_ref, w3_ref, b3_ref, out_ref):
    # ---- layer 1 (actor+critic fused): (B,5)bf16 @ (5,400)bf16 -> f32 ----
    x = x_ref[...].astype(jnp.bfloat16)
    h1 = _relu6(jnp.dot(x, w1_ref[...],
                        preferred_element_type=jnp.float32) + b1_ref[...])

    # ---- layer 2 (block-diagonal fused): (B,400)bf16 @ (400,200)bf16 ----
    h2 = _relu6(jnp.dot(h1.astype(jnp.bfloat16), w2_ref[...],
                        preferred_element_type=jnp.float32) + b2_ref[...])

    # ---- layer 3 (block-diagonal fused): (B,200)bf16 @ (200,8)bf16 ----
    out = jnp.dot(h2.astype(jnp.bfloat16), w3_ref[...],
                  preferred_element_type=jnp.float32) + b3_ref[...]
    out_ref[...] = out.astype(out_ref.dtype)          # (B, 8) lane-contiguous


def prepare_params(p):
    """Host-side one-time packing: fuse branches + bf16 weight storage."""
    # layer 1: actor | critic side-by-side
    w1 = jnp.concatenate([p["w1a"], p["w1c"]], axis=1).astype(jnp.bfloat16)  # (5, 400)
    b1 = jnp.concatenate([p["b1a"], p["b1c"]], axis=1).astype(jnp.float32)   # (1, 400)

    # layer 2: block-diagonal so a single dot keeps the branches independent
    w2 = jnp.zeros((2 * H1, 2 * H2), jnp.float32)
    w2 = w2.at[:H1, :H2].set(p["w2a"])
    w2 = w2.at[H1:, H2:].set(p["w2c"])
    w2 = w2.astype(jnp.bfloat16)                                             # (400, 200)
    b2 = jnp.concatenate([p["b2a"], p["b2c"]], axis=1).astype(jnp.float32)   # (1, 200)

    # layer 3: block-diagonal -> lanes 0:6 = logits, lane 6 = value, lane 7 pad
    w3 = jnp.zeros((2 * H2, OUT_W), jnp.float32)
    w3 = w3.at[:H2, :A_DIM].set(p["w3a"])
    w3 = w3.at[H2:, A_DIM].set(p["w3c"][:, 0])
    w3 = w3.astype(jnp.bfloat16)                                             # (200, 8)

    b3 = jnp.zeros((1, OUT_W), jnp.float32)
    b3 = b3.at[0, :A_DIM].set(p["b3a"][0])
    b3 = b3.at[0, A_DIM].set(p["b3c"][0, 0])                                 # (1, 8)

    # Guard the padding lane (output lane 7 must stay exactly zero).
    assert bool(jnp.all(w3[:, OUT_W - 1] == 0)), "w3 pad column must be zero"
    assert bool(b3[0, OUT_W - 1] == 0), "b3 pad lane must be zero"
    return dict(w1=w1, b1=b1, w2=w2, b2=b2, w3=w3, b3=b3)


def _cost_estimate(B, args):
    flops = 2 * B * (S_LEN * 2 * H1 + 2 * H1 * 2 * H2 + 2 * H2 * OUT_W)
    bytes_accessed = sum(int(a.size) * a.dtype.itemsize for a in args) + B * OUT_W * 4
    return pl.CostEstimate(flops=flops, transcendentals=0,
                           bytes_accessed=bytes_accessed)


def net_forward(x, packed):
    """Pallas implementation of Net.forward. x: (B, S_LEN) f32.

    Returns (logits (B, A_DIM), values (B, 1)).
    """
    B = x.shape[0]
    args = (x, packed["w1"], packed["b1"], packed["w2"], packed["b2"],
            packed["w3"], packed["b3"])
    out_shape = jax.ShapeDtypeStruct((B, OUT_W), jnp.float32)
    ce = _cost_estimate(B, args)

    if B >= _GRID_MIN_BATCH and B % _BATCH_BLOCK == 0:
        # Large batch: 1-D parallel grid over rows so v7x can use both
        # TensorCores.  Weights/biases use constant index_maps (VMEM resident
        # across grid steps); x / out are tiled along the batch only.
        def _const(a):
            return pl.BlockSpec(a.shape, lambda i: (0, 0))

        out = pl.pallas_call(
            net_kernel,
            out_shape=out_shape,
            grid=(B // _BATCH_BLOCK,),
            in_specs=[
                pl.BlockSpec((_BATCH_BLOCK, S_LEN), lambda i: (i, 0)),
                _const(packed["w1"]), _const(packed["b1"]),
                _const(packed["w2"]), _const(packed["b2"]),
                _const(packed["w3"]), _const(packed["b3"]),
            ],
            out_specs=pl.BlockSpec((_BATCH_BLOCK, OUT_W), lambda i: (i, 0)),
            compiler_params=pltpu.CompilerParams(
                dimension_semantics=("parallel",)),
            cost_estimate=ce,
        )(*args)
    else:
        # Small batch (typical RL rollout): single block, no grid, everything
        # in VMEM — launch/DMA latency dominates, so keep structure minimal.
        vmem = pl.BlockSpec(memory_space=pltpu.MemorySpace.VMEM)
        out = pl.pallas_call(
            net_kernel,
            out_shape=out_shape,
            in_specs=[vmem] * len(args),
            out_specs=vmem,
            cost_estimate=ce,
        )(*args)

    logits = out[:, :A_DIM]
    values = out[:, A_DIM:A_DIM + 1]
    return logits, values


def init_params(key):
    """Deterministic init mimicking set_init (normal(0, 0.1) weights, 0.1 bias)."""
    ks = jax.random.split(key, 6)

    def lin(k, fan_in, fan_out):
        w = 0.1 * jax.random.normal(k, (fan_in, fan_out), dtype=jnp.float32)
        b = jnp.full((1, fan_out), 0.1, dtype=jnp.float32)
        return w, b

    w1a, b1a = lin(ks[0], S_LEN, H1)
    w2a, b2a = lin(ks[1], H1, H2)
    w3a, b3a = lin(ks[2], H2, A_DIM)
    w1c, b1c = lin(ks[3], S_LEN, H1)
    w2c, b2c = lin(ks[4], H1, H2)
    w3c, b3c = lin(ks[5], H2, 1)
    return dict(w1a=w1a, b1a=b1a, w2a=w2a, b2a=b2a, w3a=w3a, b3a=b3a,
                w1c=w1c, b1c=b1c, w2c=w2c, b2c=b2c, w3c=w3c, b3c=b3c)


def reference_forward(x, p):
    """Unfused per-branch reference with the same bf16 operand rounding."""
    def r6(v):
        return jnp.clip(v, 0.0, 6.0)

    def dot(a, w):
        return jnp.dot(a.astype(jnp.bfloat16), w.astype(jnp.bfloat16),
                       preferred_element_type=jnp.float32)

    h1a = r6(dot(x, p["w1a"]) + p["b1a"])
    h2a = r6(dot(h1a, p["w2a"]) + p["b2a"])
    logits = dot(h2a, p["w3a"]) + p["b3a"]
    h1c = r6(dot(x, p["w1c"]) + p["b1c"])
    h2c = r6(dot(h1c, p["w2c"]) + p["b2c"])
    values = dot(h2c, p["w3c"]) + p["b3c"]
    return logits, values


if __name__ == "__main__":
    key = jax.random.PRNGKey(0)
    k_params, k_small, k_big = jax.random.split(key, 3)
    params = init_params(k_params)
    packed = prepare_params(params)

    # ---- small batch: gridless single-block path ----
    B = 8
    x = jax.random.normal(k_small, (B, S_LEN), dtype=jnp.float32)
    logits, values = jax.block_until_ready(net_forward(x, packed))
    ref_logits, ref_values = reference_forward(x, params)
    assert logits.shape == (B, A_DIM) and values.shape == (B, 1)
    assert jnp.allclose(logits, ref_logits, atol=1e-4, rtol=1e-4)
    assert jnp.allclose(values, ref_values, atol=1e-4, rtol=1e-4)

    # ---- large batch: 1-D parallel batch grid (exercises the v7x path) ----
    BG = 256
    xg = jax.random.normal(k_big, (BG, S_LEN), dtype=jnp.float32)
    logits_g, values_g = jax.block_until_ready(net_forward(xg, packed))
    ref_logits_g, ref_values_g = reference_forward(xg, params)
    assert logits_g.shape == (BG, A_DIM) and values_g.shape == (BG, 1)
    assert jnp.allclose(logits_g, ref_logits_g, atol=1e-4, rtol=1e-4)
    assert jnp.allclose(values_g, ref_values_g, atol=1e-4, rtol=1e-4)

    print("KERNEL_OK")
</pallas_src>

<mosaic_0001>
module attributes {stable_mosaic.version = 11 : i64} {
  func.func @net_kernel(%arg0: memref<8x5xf32, #tpu.memory_space<vmem>>, %arg1: memref<5x400xbf16, #tpu.memory_space<vmem>>, %arg2: memref<1x400xf32, #tpu.memory_space<vmem>>, %arg3: memref<400x200xbf16, #tpu.memory_space<vmem>>, %arg4: memref<1x200xf32, #tpu.memory_space<vmem>>, %arg5: memref<200x8xbf16, #tpu.memory_space<vmem>>, %arg6: memref<1x8xf32, #tpu.memory_space<vmem>>, %arg7: memref<8x8xf32, #tpu.memory_space<vmem>>) attributes {dimension_semantics = [], scalar_prefetch = 0 : i64, scratch_operands = 0 : i64, tpu.core_type = #tpu.core_type<tc>} {
    %c0 = arith.constant 0 : index
    %c0_0 = arith.constant 0 : index
    %0 = vector.load %arg0[%c0, %c0_0] : memref<8x5xf32, #tpu.memory_space<vmem>>, vector<8x5xf32>
    %1 = arith.truncf %0 : vector<8x5xf32> to vector<8x5xbf16>
    %c0_1 = arith.constant 0 : index
    %c0_2 = arith.constant 0 : index
    %2 = vector.load %arg1[%c0_1, %c0_2] : memref<5x400xbf16, #tpu.memory_space<vmem>>, vector<5x400xbf16>
    %cst = arith.constant dense<0.000000e+00> : vector<8x400xf32>
    %3 = tpu.matmul %1, %2, %cst {dimension_numbers = #tpu.dot_dimension_numbers<[1], [0], [0], [1], [0, 0, 1, 1], [], []>} : vector<8x5xbf16>, vector<5x400xbf16>, vector<8x400xf32> -> vector<8x400xf32>
    %c0_3 = arith.constant 0 : index
    %c0_4 = arith.constant 0 : index
    %4 = vector.load %arg2[%c0_3, %c0_4] : memref<1x400xf32, #tpu.memory_space<vmem>>, vector<1x400xf32>
    %5 = vector.broadcast %4 : vector<1x400xf32> to vector<8x400xf32>
    %6 = arith.addf %3, %5 : vector<8x400xf32>
    %cst_5 = arith.constant 0.000000e+00 : f32
    %cst_6 = arith.constant 6.000000e+00 : f32
    %7 = vector.broadcast %cst_5 : f32 to vector<8x400xf32>
    %8 = arith.maximumf %7, %6 : vector<8x400xf32>
    %9 = vector.broadcast %cst_6 : f32 to vector<8x400xf32>
    %10 = arith.minimumf %9, %8 : vector<8x400xf32>
    %11 = arith.truncf %10 : vector<8x400xf32> to vector<8x400xbf16>
    %c0_7 = arith.constant 0 : index
    %c0_8 = arith.constant 0 : index
    %12 = vector.load %arg3[%c0_7, %c0_8] : memref<400x200xbf16, #tpu.memory_space<vmem>>, vector<400x200xbf16>
    %cst_9 = arith.constant dense<0.000000e+00> : vector<8x200xf32>
    %13 = tpu.matmul %11, %12, %cst_9 {dimension_numbers = #tpu.dot_dimension_numbers<[1], [0], [0], [1], [0, 0, 1, 1], [], []>} : vector<8x400xbf16>, vector<400x200xbf16>, vector<8x200xf32> -> vector<8x200xf32>
    %c0_10 = arith.constant 0 : index
    %c0_11 = arith.constant 0 : index
    %14 = vector.load %arg4[%c0_10, %c0_11] : memref<1x200xf32, #tpu.memory_space<vmem>>, vector<1x200xf32>
    %15 = vector.broadcast %14 : vector<1x200xf32> to vector<8x200xf32>
    %16 = arith.addf %13, %15 : vector<8x200xf32>
    %cst_12 = arith.constant 0.000000e+00 : f32
    %cst_13 = arith.constant 6.000000e+00 : f32
    %17 = vector.broadcast %cst_12 : f32 to vector<8x200xf32>
    %18 = arith.maximumf %17, %16 : vector<8x200xf32>
    %19 = vector.broadcast %cst_13 : f32 to vector<8x200xf32>
    %20 = arith.minimumf %19, %18 : vector<8x200xf32>
    %21 = arith.truncf %20 : vector<8x200xf32> to vector<8x200xbf16>
    %c0_14 = arith.constant 0 : index
    %c0_15 = arith.constant 0 : index
    %22 = vector.load %arg5[%c0_14, %c0_15] : memref<200x8xbf16, #tpu.memory_space<vmem>>, vector<200x8xbf16>
    %cst_16 = arith.constant dense<0.000000e+00> : vector<8x8xf32>
    %23 = tpu.matmul %21, %22, %cst_16 {dimension_numbers = #tpu.dot_dimension_numbers<[1], [0], [0], [1], [0, 0, 1, 1], [], []>} : vector<8x200xbf16>, vector<200x8xbf16>, vector<8x8xf32> -> vector<8x8xf32>
    %c0_17 = arith.constant 0 : index
    %c0_18 = arith.constant 0 : index
    %24 = vector.load %arg6[%c0_17, %c0_18] : memref<1x8xf32, #tpu.memory_space<vmem>>, vector<1x8xf32>
    %25 = vector.broadcast %24 : vector<1x8xf32> to vector<8x8xf32>
    %26 = arith.addf %23, %25 : vector<8x8xf32>
    %c0_19 = arith.constant 0 : index
    %c0_20 = arith.constant 0 : index
    %27 = vector.load %arg7[%c0_19, %c0_20] : memref<8x8xf32, #tpu.memory_space<vmem>>, vector<8x8xf32>
    tpu.vector_store %arg7[%c0_19, %c0_20], %26 {strides = array<i32>} : memref<8x8xf32, #tpu.memory_space<vmem>>, vector<8x8xf32>,
    return
  }
}

</mosaic_0001>

<bundles_post_ra>
// kernel: tpu_custom_call.1
= control target key start
LH: loop header
LB: loop body
LE: loop exit
PB: predicated region body
PF: predicated region fallthrough
CT: control target
= control target key end

     0   :  { %12 = vsyncpa [#allocation3], 0  ;;  %s1216_s0 = inlined_call_operand.vmem [shape: f32[8,5], index: 0, kind: input, shape index: {}]   ;;  %s1217_s1 = inlined_call_operand.vmem [shape: bf16[5,400], index: 1, kind: input, shape index: {}]   ;;  %s1218_s2 = inlined_call_operand.vmem [shape: f32[1,400], index: 2, kind: input, shape index: {}]   ;;  %s1219_s3 = inlined_call_operand.hbm [shape: bf16[400,200], index: 3, kind: input, shape index: {}]   ;;  %s1220_s4 = inlined_call_operand.vmem [shape: f32[1,200], index: 4, kind: input, shape index: {}]   ;;  %s1221_s5 = inlined_call_operand.vmem [shape: bf16[200,8], index: 5, kind: input, shape index: {}]   ;;  %s1222_s6 = inlined_call_operand.vmem [shape: f32[1,8], index: 6, kind: input, shape index: {}]   ;;  %s1223_s7 = inlined_call_operand.hbm [shape: f32[8,8], index: 7, kind: output, shape index: {}]  }
   0x1   :  { %13 = vsyncpa [#allocation4], 0  ;;  %s24_s26 = sshll.u32 %s1219_s3, 4  ;;  %s1104_s27 = smov [#allocation2]   ;;  %s25_s26 = int_to_ptr.hbm [resolvable:$true] %s24_s26 }
   0x2   :  { %s26_s28 = sshll.u32 %s1104_s27, 4  ;;  %s1105_s29 = smov 128   ;;  %s27_s28 = int_to_ptr.vmem [resolvable:$true] %s26_s28 }
   0x3   :  { %s1106_s30 = smov 8  }
   0x4   :  { %32 = dma.hbm_to_vmem [thread:$0]  %s25_s26, 6400, %s27_s28, [#allocation3], %s1105_s29, %s1105_s29, %s1106_s30  }
   0x5   :  { %1100 = dma.done.wait [#allocation3], 6400  }
   0x6   :  { %1101 = vsyncadd [#allocation3], 4294960896  ;;  %vm72_vm0 = vcmask 1041408   ;;  %vm73_vm1 = vcmask 1042432   ;;  %v1107_v0 = vmov 65535   ;;  %v44_v17 = vld [vmem:[%s1216_s0] sm:$0xff] }
   0x7   :  { %v74_v1 = vsel %vm72_vm0, 4294967295, %v1107_v0  ;;  %v46_v2 = vld [vmem:[%s1217_s1] sm:$0x77]  ;;  %v47_v3 = vld [vmem:[%s1217_s1 + $0x8] sm:$0x77]  ;;  %v45_v25 = vpack.c.bf16 %v44_v17, %v44_v17  ;;  %vm68_vm2 = vcmask 39936  }
   0x8   :  { %v60_v4 = vunpack.c.l.b16 %v46_v2  ;;  %v61_v5 = vunpack.c.h.b16 %v46_v2  ;;  %v62_v6 = vunpack.c.l.b16 %v47_v3  ;;  %v63_v7 = vunpack.c.h.b16 %v47_v3  ;;  %v791_v8 = vld [vmem:[#allocation2 + $0x70] sm:$0xf]  ;;  %v999_v9 = vld [vmem:[#allocation2 + $0x74] sm:$0xf0]  ;;  %v783_v24 = vld [vmem:[#allocation2 + $0x60] sm:$0xf] }
   0x9   :  { %v855_v10 = vld [vmem:[#allocation2 + $0xf0] sm:$0xf]  ;;  %v75_v11 = vsel %vm73_vm1, %v74_v1, 0  ;;  %v1015_v12 = vld [vmem:[#allocation2 + $0xf4] sm:$0xf0]  ;;  %v792_v18 = vor.u32 %v999_v9, %v791_v8  ;;  %vm458_vm3 = vcmask 130048  }
   0xa   :  { %v64_v13 = vpack.c.b16 %v60_v4, %v60_v4  ;;  %v65_v14 = vpack.c.b16 %v61_v5, %v61_v5  ;;  %v66_v15 = vpack.c.b16 %v62_v6, %v62_v6  ;;  %v67_v16 = vpack.c.b16 %v63_v7, %v63_v7  ;;  %v997_v26 = vld [vmem:[#allocation2 + $0x64] sm:$0xf0]  ;;  %v847_v27 = vld [vmem:[#allocation2 + $0xe0] sm:$0xf]  ;;  %v919_v29 = vld [vmem:[#allocation2 + $0x170] sm:$0xf] }
   0xb   :  { %v856_v19 = vor.u32 %v1015_v12, %v855_v10  ;;  %v1013_v28 = vld [vmem:[#allocation2 + $0xe4] sm:$0xf0]  ;;  %v1031_v30 = vld [vmem:[#allocation2 + $0x174] sm:$0xf0]  ;;  %v784_v31 = vor.u32 %v997_v26, %v783_v24  ;;  %v775_v33 = vld [vmem:[#allocation2 + $0x50] sm:$0xf] }
   0xc   :  { %v77_v20 = vand.u32 %v75_v11, %v64_v13  ;;  %v80_v21 = vand.u32 %v75_v11, %v65_v14  ;;  %v83_v22 = vand.u32 %v75_v11, %v66_v15  ;;  %v86_v23 = vand.u32 %v75_v11, %v67_v16  ;;  %v995_v34 = vld [vmem:[#allocation2 + $0x54] sm:$0xf0]  ;;  %v911_v36 = vld [vmem:[#allocation2 + $0x160] sm:$0xf]  ;;  %v839_v37 = vld [vmem:[#allocation2 + $0xd0] sm:$0xf] }
   0xd   :  { %v848_v32 = vor.u32 %v1013_v28, %v847_v27  ;;  %v920_v35 = vor.u32 %v1031_v30, %v919_v29  ;;  %v1011_v38 = vld [vmem:[#allocation2 + $0xd4] sm:$0xf0]  ;;  %v1029_v39 = vld [vmem:[#allocation2 + $0x164] sm:$0xf0]  ;;  %v776_v41 = vor.u32 %v995_v34, %v775_v33  ;;  %v767_v43 = vld [vmem:[#allocation2 + $0x40] sm:$0xf] }
   0xe   :  { %95 = vmatpush.bf16.msra.mxu0 %v77_v20  ;;  %108 = vmatpush.bf16.msra.mxu1 %v80_v21  ;;  %v912_v40 = vor.u32 %v1029_v39, %v911_v36  ;;  %v840_v42 = vor.u32 %v1011_v38, %v839_v37  ;;  %v903_v44 = vld [vmem:[#allocation2 + $0x150] sm:$0xf]  ;;  %v1027_v45 = vld [vmem:[#allocation2 + $0x154] sm:$0xf0]  ;;  %v993_v46 = vld [vmem:[#allocation2 + $0x44] sm:$0xf0] }
   0xf   :  { %121 = vmatpush.bf16.msra.mxu2 %v83_v22  ;;  %134 = vmatpush.bf16.msra.mxu3 %v86_v23  ;;  %v831_v47 = vld [vmem:[#allocation2 + $0xc0] sm:$0xf]  ;;  %v1009_v48 = vld [vmem:[#allocation2 + $0xc4] sm:$0xf0]  ;;  %v759_v49 = vld [vmem:[#allocation2 + $0x30] sm:$0xf]  ;;  %v904_v51 = vor.u32 %v1027_v45, %v903_v44  ;;  %v768_v53 = vor.u32 %v993_v46, %v767_v43 }
  0x10   :  { %v991_v50 = vld [vmem:[#allocation2 + $0x34] sm:$0xf0]  ;;  %v895_v52 = vld [vmem:[#allocation2 + $0x140] sm:$0xf]  ;;  %v832_v54 = vor.u32 %v1009_v48, %v831_v47  ;;  %v1025_v55 = vld [vmem:[#allocation2 + $0x144] sm:$0xf0] }
  0x11   :  { %729 = vmatmul.msk.bf16.vlgmr.msra.gmra.mxu0 %vm68_vm2, %v45_v25  ;;  %730 = vmatmul.msk.bf16.vlgmr.msra.gmra.mxu1 %vm68_vm2, %v45_v25  ;;  %v927_v56 = vld [vmem:[#allocation2 + $0x180] sm:$0xf]  ;;  %v1033_v57 = vld [vmem:[#allocation2 + $0x184] sm:$0xf0]  ;;  %v823_v58 = vld [vmem:[#allocation2 + $0xb0] sm:$0xf]  ;;  %v896_v61 = vor.u32 %v1025_v55, %v895_v52  ;;  %v760_v62 = vor.u32 %v991_v50, %v759_v49 }
  0x12   :  { %462 = vmatpush.bf16.msrb.mxu0 %v792_v18  ;;  %475 = vmatpush.bf16.msrb.mxu1 %v856_v19  ;;  %v1007_v59 = vld [vmem:[#allocation2 + $0xb4] sm:$0xf0]  ;;  %v928_v60 = vor.u32 %v1033_v57, %v927_v56  ;;  %v751_v0 = vld [vmem:[#allocation2 + $0x20] sm:$0xf]  ;;  %v989_v1 = vld [vmem:[#allocation2 + $0x24] sm:$0xf0] }
  0x13   :  { %731 = vmatmul.msk.bf16.vlgmr.msra.gmra.mxu2 %vm68_vm2, %v45_v25  ;;  %732 = vmatmul.msk.bf16.vlgmr.msra.gmra.mxu3 %vm68_vm2, %v45_v25  ;;  %v824_v63 = vor.u32 %v1007_v59, %v823_v58  ;;  %v815_v2 = vld [vmem:[#allocation2 + $0xa0] sm:$0xf]  ;;  %v1005_v3 = vld [vmem:[#allocation2 + $0xa4] sm:$0xf0]  ;;  %v752_v4 = vor.u32 %v989_v1, %v751_v0  ;;  %v743_v6 = vld [vmem:[#allocation2 + $0x10] sm:$0xf] }
  0x14   :  { %488 = vmatpush.bf16.msrb.mxu2 %v920_v35  ;;  %508 = vmatpush.bf16.msrb.mxu3 %v928_v60  ;;  %v816_v5 = vor.u32 %v1005_v3, %v815_v2  ;;  %v987_v7 = vld [vmem:[#allocation2 + $0x14] sm:$0xf0]  ;;  %v807_v8 = vld [vmem:[#allocation2 + $0x90] sm:$0xf]  ;;  %v735_v12 = vld [vmem:[#allocation2] sm:$0xf] }
  0x15   :  { %v1003_v9 = vld [vmem:[#allocation2 + $0x94] sm:$0xf0]  ;;  %v744_v10 = vor.u32 %v987_v7, %v743_v6  ;;  %v985_v13 = vld [vmem:[#allocation2 + $0x4] sm:$0xf0]  ;;  %v799_v14 = vld [vmem:[#allocation2 + $0x80] sm:$0xf] }
  0x16   :  { %463 = vmatpush.bf16.msrb.mxu0 %v784_v31  ;;  %476 = vmatpush.bf16.msrb.mxu1 %v848_v32  ;;  %v808_v11 = vor.u32 %v1003_v9, %v807_v8  ;;  %v1001_v15 = vld [vmem:[#allocation2 + $0x84] sm:$0xf0]  ;;  %v1014_v16 = vld [vmem:[#allocation2 + $0xf4] sm:$0xf]  ;;  %v857_v17 = vld [vmem:[#allocation2 + $0xf8] sm:$0xf0]  ;;  %v736_v20 = vor.u32 %v985_v13, %v735_v12 }
  0x17   :  { %v1030_v18 = vld [vmem:[#allocation2 + $0x174] sm:$0xf]  ;;  %v921_v19 = vld [vmem:[#allocation2 + $0x178] sm:$0xf0]  ;;  %v800_v21 = vor.u32 %v1001_v15, %v799_v14  ;;  %v860_v22 = vor.u32 %v1014_v16, %v857_v17  ;;  %v1012_v24 = vld [vmem:[#allocation2 + $0xe4] sm:$0xf] }
  0x18   :  { %489 = vmatpush.bf16.msrb.mxu2 %v912_v40  ;;  %v924_v23 = vor.u32 %v1030_v18, %v921_v19  ;;  %v849_v25 = vld [vmem:[#allocation2 + $0xe8] sm:$0xf0]  ;;  %v1028_v26 = vld [vmem:[#allocation2 + $0x164] sm:$0xf]  ;;  %v887_v30 = vld [vmem:[#allocation2 + $0x130] sm:$0xf] }
  0x19   :  { %v913_v27 = vld [vmem:[#allocation2 + $0x168] sm:$0xf0]  ;;  %v852_v28 = vor.u32 %v1012_v24, %v849_v25  ;;  %v1023_v31 = vld [vmem:[#allocation2 + $0x134] sm:$0xf0]  ;;  %v998_v32 = vld [vmem:[#allocation2 + $0x74] sm:$0xf] }
  0x1a   :  { %464 = vmatpush.bf16.msrb.mxu0 %v776_v41  ;;  %477 = vmatpush.bf16.msrb.mxu1 %v840_v42  ;;  %v916_v29 = vor.u32 %v1028_v26, %v913_v27  ;;  %v888_v33 = vor.u32 %v1023_v31, %v887_v30  ;;  %v793_v34 = vld [vmem:[#allocation2 + $0x78] sm:$0xf0]  ;;  %v1010_v36 = vld [vmem:[#allocation2 + $0xd4] sm:$0xf]  ;;  %v879_v42 = vld [vmem:[#allocation2 + $0x120] sm:$0xf] }
  0x1b   :  { %v796_v35 = vor.u32 %v998_v32, %v793_v34  ;;  %v841_v37 = vld [vmem:[#allocation2 + $0xd8] sm:$0xf0]  ;;  %v1026_v39 = vld [vmem:[#allocation2 + $0x154] sm:$0xf]  ;;  %v1021_v43 = vld [vmem:[#allocation2 + $0x124] sm:$0xf0] }
  0x1c   :  { %490 = vmatpush.bf16.msrb.mxu2 %v904_v51  ;;  %v844_v38 = vor.u32 %v1010_v36, %v841_v37  ;;  %v905_v40 = vld [vmem:[#allocation2 + $0x158] sm:$0xf0]  ;;  %v996_v44 = vld [vmem:[#allocation2 + $0x64] sm:$0xf]  ;;  %v880_v45 = vor.u32 %v1021_v43, %v879_v42  ;;  %v785_v46 = vld [vmem:[#allocation2 + $0x68] sm:$0xf0] }
  0x1d   :  { %514 = vmatpush.bf16.msra.mxu3 %v796_v35  ;;  %v908_v41 = vor.u32 %v1026_v39, %v905_v40  ;;  %v788_v47 = vor.u32 %v996_v44, %v785_v46  ;;  %v1008_v48 = vld [vmem:[#allocation2 + $0xc4] sm:$0xf]  ;;  %v833_v49 = vld [vmem:[#allocation2 + $0xc8] sm:$0xf0]  ;;  %v1019_v55 = vld [vmem:[#allocation2 + $0x114] sm:$0xf0] }
  0x1e   :  { %465 = vmatpush.bf16.msrb.mxu0 %v768_v53  ;;  %478 = vmatpush.bf16.msrb.mxu1 %v832_v54  ;;  %v1024_v50 = vld [vmem:[#allocation2 + $0x144] sm:$0xf]  ;;  %v836_v51 = vor.u32 %v1008_v48, %v833_v49  ;;  %v897_v52 = vld [vmem:[#allocation2 + $0x148] sm:$0xf0]  ;;  %v871_v54 = vld [vmem:[#allocation2 + $0x110] sm:$0xf] }
  0x1f   :  { %v900_v53 = vor.u32 %v1024_v50, %v897_v52  ;;  %v872_v56 = vor.u32 %v1019_v55, %v871_v54  ;;  %v994_v57 = vld [vmem:[#allocation2 + $0x54] sm:$0xf]  ;;  %v777_v58 = vld [vmem:[#allocation2 + $0x58] sm:$0xf0]  ;;  %v863_v2 = vld [vmem:[#allocation2 + $0x100] sm:$0xf] }
  0x20   :  { %491 = vmatpush.bf16.msrb.mxu2 %v896_v61  ;;  %v780_v59 = vor.u32 %v994_v57, %v777_v58  ;;  %v1006_v60 = vld [vmem:[#allocation2 + $0xb4] sm:$0xf]  ;;  %v825_v61 = vld [vmem:[#allocation2 + $0xb8] sm:$0xf0]  ;;  %v1017_v3 = vld [vmem:[#allocation2 + $0x104] sm:$0xf0] }
  0x21   :  { %515 = vmatpush.bf16.msra.mxu3 %v788_v47  ;;  %v889_v0 = vld [vmem:[#allocation2 + $0x138] sm:$0xf0]  ;;  %v769_v6 = vld [vmem:[#allocation2 + $0x48] sm:$0xf0]  ;;  %v1004_v8 = vld [vmem:[#allocation2 + $0xa4] sm:$0xf] }
  0x22   :  { %466 = vmatpush.bf16.msrb.mxu0 %v760_v62  ;;  %479 = vmatpush.bf16.msrb.mxu1 %v824_v63  ;;  %v1022_v62 = vld [vmem:[#allocation2 + $0x134] sm:$0xf]  ;;  %v828_v63 = vor.u32 %v1006_v60, %v825_v61  ;;  %v817_v9 = vld [vmem:[#allocation2 + $0xa8] sm:$0xf0]  ;;  %v761_v15 = vld [vmem:[#allocation2 + $0x38] sm:$0xf0] }
  0x23   :  { %v892_v1 = vor.u32 %v1022_v62, %v889_v0  ;;  %v881_v12 = vld [vmem:[#allocation2 + $0x128] sm:$0xf0]  ;;  %v990_v14 = vld [vmem:[#allocation2 + $0x34] sm:$0xf]  ;;  %v809_v18 = vld [vmem:[#allocation2 + $0x98] sm:$0xf0] }
  0x24   :  { %492 = vmatpush.bf16.msrb.mxu2 %v888_v33  ;;  %v764_v16 = vor.u32 %v990_v14, %v761_v15  ;;  %v1002_v17 = vld [vmem:[#allocation2 + $0x94] sm:$0xf]  ;;  %v1032_v26 = vld [vmem:[#allocation2 + $0x184] sm:$0xf]  ;;  %v929_v27 = vld [vmem:[#allocation2 + $0x188] sm:$0xf0] }
  0x25   :  { %516 = vmatpush.bf16.msra.mxu3 %v780_v59  ;;  %v1018_v19 = vld [vmem:[#allocation2 + $0x114] sm:$0xf]  ;;  %v801_v30 = vld [vmem:[#allocation2 + $0x88] sm:$0xf0]  ;;  %v1016_v31 = vld [vmem:[#allocation2 + $0x104] sm:$0xf] }
  0x26   :  { %467 = vmatpush.bf16.msrb.mxu0 %v752_v4  ;;  %480 = vmatpush.bf16.msrb.mxu1 %v816_v5  ;;  %v992_v4 = vld [vmem:[#allocation2 + $0x44] sm:$0xf]  ;;  %v864_v5 = vor.u32 %v1017_v3, %v863_v2  ;;  %v865_v32 = vld [vmem:[#allocation2 + $0x108] sm:$0xf0]  ;;  %v986_v35 = vld [vmem:[#allocation2 + $0x14] sm:$0xf] }
  0x27   :  { %v772_v7 = vor.u32 %v992_v4, %v769_v6  ;;  %v868_v34 = vor.u32 %v1016_v31, %v865_v32  ;;  %v745_v36 = vld [vmem:[#allocation2 + $0x18] sm:$0xf0]  ;;  %v737_v39 = vld [vmem:[#allocation2 + $0x8] sm:$0xf0]  ;;  %v48_v40 = vld [vmem:[%s1218_s2] sm:$0xf] }
  0x28   :  { %493 = vmatpush.bf16.msrb.mxu2 %v880_v45  ;;  %v748_v37 = vor.u32 %v986_v35, %v745_v36  ;;  %v50_v42 = vperm.slane %v48_v40, 0  ;;  %v51_v43 = vperm.slane %v48_v40, 1  ;;  %v52_v50 = vperm.slane %v48_v40, 2  ;;  %v1041_v2 = vld [vmem:[%s1221_s5 + $0x38] sm:$0xff]  ;;  %v596_v14 = vld [vmem:[%s1221_s5 + $0x60] sm:$0xf] }
  0x29   :  { %517 = vmatpush.bf16.msra.mxu3 %v772_v7  ;;  %v1040_v7 = vld [vmem:[%s1221_s5 + $0x30] sm:$0xff]  ;;  %v650_v15 = vunpack.c.l.b16 %v596_v14  ;;  %vm680_vm4 = vcmask 1043456   ;;  %vm676_vm5 = vcmask 588800   ;;  %s1108_s13 = smov [#allocation5]   ;;  %s719_s17 = sshll.u32 %s1223_s7, 4  ;;  %vm710_vm6 = vcmask 64512   ;;  %s720_s17 = int_to_ptr.hbm [resolvable:$true] %s719_s17 }
  0x2a   :  { %468 = vmatpush.bf16.msrb.mxu0 %v744_v10  ;;  %481 = vmatpush.bf16.msrb.mxu1 %v808_v11  ;;  %v1020_v10 = vld [vmem:[#allocation2 + $0x124] sm:$0xf]  ;;  %v820_v11 = vor.u32 %v1004_v8, %v817_v9  ;;  %v1039_v8 = vld [vmem:[%s1221_s5 + $0x28] sm:$0xff]  ;;  %s717_s14 = sshll.u32 %s1108_s13, 4  ;;  %s718_s14 = int_to_ptr.vmem [resolvable:$true] %s717_s14 }
  0x2b   :  { %v884_v13 = vor.u32 %v1020_v10, %v881_v12  ;;  %v1038_v9 = vld [vmem:[%s1221_s5 + $0x20] sm:$0xff]  ;;  %v1037_v10 = vld [vmem:[%s1221_s5 + $0x18] sm:$0xff]  ;;  %v1035_v12 = vld [vmem:[%s1221_s5 + $0x8] sm:$0xff] }
  0x2c   :  { %494 = vmatpush.bf16.msrb.mxu2 %v872_v56 }
  0x2d   :  { %518 = vmatpush.bf16.msra.mxu3 %v764_v16  ;;  %v663_v16 = vpack.c.b16 %v650_v15, %v650_v15 }
  0x2e   :  { %469 = vmatpush.bf16.msrb.mxu0 %v736_v20  ;;  %482 = vmatpush.bf16.msrb.mxu1 %v800_v21  ;;  %v812_v20 = vor.u32 %v1002_v17, %v809_v18  ;;  %v873_v21 = vld [vmem:[#allocation2 + $0x118] sm:$0xf0] }
  0x2f   :  { %v876_v24 = vor.u32 %v1018_v19, %v873_v21  ;;  %v682_v17 = vsel %vm680_vm4, %v663_v16, 0  ;;  %v1045_v18 = vld [vmem:[%s1221_s5 + $0x58] sm:$0xff]  ;;  %v202_v19 = vld [vmem:[%s1220_s4] sm:$0x3] }
  0x30   :  { %495 = vmatpush.bf16.msrb.mxu2 %v864_v5 }
  0x32   :  { %527 = vmatpush.bf16.msra.mxu0 %v860_v22  ;;  %540 = vmatpush.bf16.msra.mxu1 %v924_v23  ;;  %v988_v22 = vld [vmem:[#allocation2 + $0x24] sm:$0xf]  ;;  %v753_v23 = vld [vmem:[#allocation2 + $0x28] sm:$0xf0] }
  0x33   :  { %v756_v25 = vor.u32 %v988_v22, %v753_v23  ;;  %v204_v23 = vperm.slane %v202_v19, 0 }
  0x35   :  { %519 = vmatpush.bf16.msra.mxu3 %v756_v25 }
  0x36   :  { %528 = vmatpush.bf16.msra.mxu0 %v852_v28  ;;  %541 = vmatpush.bf16.msra.mxu1 %v916_v29  ;;  %v1000_v28 = vld [vmem:[#allocation2 + $0x84] sm:$0xf]  ;;  %v932_v29 = vor.u32 %v1032_v26, %v929_v27 }
  0x37   :  { %v804_v33 = vor.u32 %v1000_v28, %v801_v30  ;;  %v1042_v26 = vld [vmem:[%s1221_s5 + $0x40] sm:$0xff] }
  0x38   :  { %560 = vmatpush.bf16.msra.mxu2 %v932_v29 }
  0x39   :  { %520 = vmatpush.bf16.msra.mxu3 %v748_v37 }
  0x3a   :  { %529 = vmatpush.bf16.msra.mxu0 %v844_v38  ;;  %542 = vmatpush.bf16.msra.mxu1 %v908_v41  ;;  %v984_v38 = vld [vmem:[#allocation2 + $0x4] sm:$0xf] }
  0x3b   :  { %v740_v41 = vor.u32 %v984_v38, %v737_v39 }
  0x3d   :  { %521 = vmatpush.bf16.msra.mxu3 %v740_v41 }
  0x3e   :  { %530 = vmatpush.bf16.msra.mxu0 %v836_v51  ;;  %543 = vmatpush.bf16.msra.mxu1 %v900_v53  ;;  %v53_v51 = vperm.slane %v48_v40, 3 }
  0x42   :  { %531 = vmatpush.bf16.msra.mxu0 %v828_v63  ;;  %544 = vmatpush.bf16.msra.mxu1 %v892_v1 }
  0x46   :  { %532 = vmatpush.bf16.msra.mxu0 %v820_v11  ;;  %545 = vmatpush.bf16.msra.mxu1 %v884_v13  ;;  %v1036_v11 = vld [vmem:[%s1221_s5 + $0x10] sm:$0xff]  ;;  %v1034_v13 = vld [vmem:[%s1221_s5] sm:$0xff] }
  0x4a   :  { %533 = vmatpush.bf16.msra.mxu0 %v812_v20  ;;  %546 = vmatpush.bf16.msra.mxu1 %v876_v24  ;;  %v1044_v20 = vld [vmem:[%s1221_s5 + $0x50] sm:$0xff]  ;;  %v1043_v24 = vld [vmem:[%s1221_s5 + $0x48] sm:$0xff] }
  0x4e   :  { %534 = vmatpush.bf16.msra.mxu0 %v804_v33  ;;  %547 = vmatpush.bf16.msra.mxu1 %v868_v34 }
  0x8e   :  { %v97_v44 = vpop.f32.mrf.mxu0  ;;  %v110_v45 = vpop.f32.mrf.mxu1 }
  0x8f   :  { %v98_v46 = vadd.f32 %v97_v44, %v50_v42  ;;  %v111_v47 = vadd.f32 %v110_v45, %v51_v43  ;;  %v205_v43 = vperm.slane %v202_v19, 1 }
  0x91   :  { %v140_v48 = vmax.f32 %v98_v46, 0.0  ;;  %v141_v49 = vmax.f32 %v111_v47, 0.0 }
  0x93   :  { %v144_v52 = vmin.f32 %v140_v48, 6.0  ;;  %v145_v53 = vmin.f32 %v141_v49, 6.0 }
  0x95   :  { %v148_v54 = vpack.c.bf16 %v144_v52, %v144_v52  ;;  %v149_v55 = vpack.c.bf16 %v145_v53, %v145_v53 }
  0x96   :  { %v123_v56 = vpop.f32.mrf.mxu2  ;;  %v136_v57 = vpop.f32.mrf.mxu3 }
  0x97   :  { %v124_v58 = vadd.f32 %v123_v56, %v52_v50  ;;  %v137_v59 = vadd.f32 %v136_v57, %v53_v51  ;;  %v99_v60 = vpop.f32.mrf.mxu0  ;;  %v112_v61 = vpop.f32.mrf.mxu1  ;;  %470 = vmatmul.bf16.vlgmr.msrb.gmra.mxu0 %v148_v54  ;;  %483 = vmatmul.bf16.vlgmr.msrb.gmra.mxu1 %v149_v55  ;;  %v1051_v57 = vld [vmem:[%s1222_s6] ss:$0 sm:$0xff] }
  0x99   :  { %v142_v62 = vmax.f32 %v124_v58, 0.0  ;;  %v143_v63 = vmax.f32 %v137_v59, 0.0 }
  0x9b   :  { %v146_v0 = vmin.f32 %v142_v62, 6.0  ;;  %v147_v1 = vmin.f32 %v143_v63, 6.0 }
  0x9d   :  { %v150_v3 = vpack.c.bf16 %v146_v0, %v146_v0  ;;  %v151_v4 = vpack.c.bf16 %v147_v1, %v147_v1 }
  0x9e   :  { %v125_v5 = vpop.f32.mrf.mxu2  ;;  %v138_v6 = vpop.f32.mrf.mxu3 }
  0x9f   :  { %496 = vmatmul.bf16.vlgmr.msrb.gmra.mxu2 %v150_v3  ;;  %933 = vmatmul.msk.bf16.vlgmr.msrb.gmra.mxu3 %vm458_vm3, %v151_v4 }
  0xa0   :  { %684 = vmatpush.bf16.msrb.mxu2 %v1041_v2  ;;  %700 = vmatpush.bf16.msrb.mxu3 %v682_v17 }
  0xa4   :  { %685 = vmatpush.bf16.msrb.mxu2 %v1040_v7  ;;  %701 = vmatpush.bf16.msrb.mxu3 %v1045_v18 }
  0xa7   :  { %535 = vmatmul.bf16.vlgmr.msra.gmra.mxu0 %v149_v55  ;;  %548 = vmatmul.bf16.vlgmr.msra.gmra.mxu1 %v150_v3 }
  0xa8   :  { %686 = vmatpush.bf16.msrb.mxu2 %v1039_v8  ;;  %702 = vmatpush.bf16.msrb.mxu3 %v1044_v20 }
  0xac   :  { %687 = vmatpush.bf16.msrb.mxu2 %v1038_v9  ;;  %703 = vmatpush.bf16.msrb.mxu3 %v1043_v24 }
  0xaf   :  { %522 = vmatmul.bf16.vlgmr.msra.gmra.mxu3 %v148_v54  ;;  %934 = vmatmul.msk.bf16.vlgmr.msra.gmra.mxu2 %vm458_vm3, %v151_v4 }
  0xb0   :  { %688 = vmatpush.bf16.msrb.mxu2 %v1037_v10  ;;  %704 = vmatpush.bf16.msrb.mxu3 %v1042_v26 }
  0xb4   :  { %689 = vmatpush.bf16.msrb.mxu2 %v1036_v11 }
  0xb8   :  { %690 = vmatpush.bf16.msrb.mxu2 %v1035_v12 }
  0xbc   :  { %691 = vmatpush.bf16.msrb.mxu2 %v1034_v13 }
 0x114   :  { %v471_v21 = vpop.f32.mrf.mxu0  ;;  %v484_v22 = vpop.f32.mrf.mxu1 }
 0x115   :  { %v472_v25 = vadd.f32 %v471_v21, %v204_v23 }
 0x117   :  { %v485_v29 = vadd.f32 %v484_v22, %v472_v25 }
 0x11c   :  { %v473_v27 = vpop.f32.mrf.mxu0  ;;  %v486_v28 = vpop.f32.mrf.mxu1 }
 0x122   :  { %v497_v30 = vpop.f32.mrf.mxu2  ;;  %v510_v31 = vpop.f32.mrf.mxu3 }
 0x123   :  { %v498_v32 = vadd.f32 %v497_v30, %v485_v29 }
 0x124   :  { %v536_v34 = vpop.f32.mrf.mxu0  ;;  %v549_v35 = vpop.f32.mrf.mxu1 }
 0x125   :  { %v511_v33 = vadd.f32 %v510_v31, %v498_v32 }
 0x127   :  { %v566_v36 = vmax.f32 %v511_v33, 0.0 }
 0x129   :  { %v568_v37 = vmin.f32 %v566_v36, 6.0 }
 0x12a   :  { %v499_v38 = vpop.f32.mrf.mxu2  ;;  %v512_v39 = vpop.f32.mrf.mxu3 }
 0x12b   :  { %v570_v40 = vpack.c.bf16 %v568_v37, %v568_v37 }
 0x12c   :  { %v538_v41 = vpop.f32.mrf.mxu0  ;;  %v551_v42 = vpop.f32.mrf.mxu1 }
 0x12d   :  { %692 = vmatmul.bf16.vlgmr.msrb.gmra.mxu2 %v570_v40 }
 0x132   :  { %v523_v44 = vpop.f32.mrf.mxu3  ;;  %v562_v45 = vpop.f32.mrf.mxu2 }
 0x133   :  { %v524_v46 = vadd.f32 %v523_v44, %v205_v43 }
 0x135   :  { %v537_v47 = vadd.f32 %v536_v34, %v524_v46 }
 0x137   :  { %v550_v48 = vadd.f32 %v549_v35, %v537_v47 }
 0x139   :  { %v563_v49 = vadd.f32 %v562_v45, %v550_v48 }
 0x13a   :  { %v525_v50 = vpop.f32.mrf.mxu3  ;;  %v564_v51 = vpop.f32.mrf.mxu2 }
 0x13b   :  { %v567_v52 = vmax.f32 %v563_v49, 0.0 }
 0x13d   :  { %v569_v53 = vmin.f32 %v567_v52, 6.0 }
 0x13f   :  { %v571_v54 = vpack.c.bf16 %v569_v53, %v569_v53 }
 0x141   :  { %983 = vmatmul.msk.bf16.vlgmr.msrb.gmra.mxu3 %vm676_vm5, %v571_v54 }
 0x1b0   :  { %v693_v55 = vpop.f32.mrf.mxu2 }
 0x1b1   :  { %v694_v58 = vadd.f32 %v1051_v57, %v693_v55 }
 0x1b8   :  { %v695_v56 = vpop.f32.mrf.mxu2 }
 0x1c4   :  { %v706_v59 = vpop.f32.mrf.mxu3 }
 0x1c5   :  { %v707_v60 = vadd.f32 %v706_v59, %v694_v58 }
 0x1c7   :  { %711 = vst.msk [vmem:[#allocation5] sm:$0xff] %vm710_vm6, %v707_v60 }
 0x1c8   :  { %722 = dma.vmem_to_hbm [thread:$0]  %s718_s14, 128, %s720_s17, [#allocation4]  }
 0x1cc   :  { %v708_v61 = vpop.f32.mrf.mxu3 }
 0x1cd   :  { %1102 = dma.done.wait [#allocation4], 128  }
 0x1ce   :  { %1103 = vsyncadd [#allocation4], 4294967168 }
 0x1cf   :  { %727 = vsyncpa [#allocation3], 1 }
 0x1d0   :  { %728 = vsyncpa [#allocation4], 1 }

</bundles_post_ra>
